<compile_context>
chip_gen: v7x
topology: tpu7x:2x2x1
jax: 0.10.0
libtpu: 0.0.40
codegen_flags: <defaults>
</compile_context>

<pallas_src>
import functools

import jax
import jax.numpy as jnp
from jax import lax
from jax.experimental import pallas as pl
from jax.experimental.pallas import tpu as pltpu


_NEG_BIG = -1e30


def _round_up(x, m):
    return (x + m - 1) // m * m


# ---------------------------------------------------------------------------
# Kernel 1: row-wise L2 normalization.
# torch F.normalize(x, dim=1) == x * rsqrt(max(||x||^2, 1e-24))   (EUP rsqrt)
# Second output: sum-of-squares of the emitted (possibly dtype-cast) rows —
# i.e. the exact numerator of the self-similarity logit the loss kernel sees.
# ---------------------------------------------------------------------------
def _normalize_kernel(x_ref, o_ref, ss_ref):
    x = x_ref[...].astype(jnp.float32)
    ss = jnp.sum(x * x, axis=1, keepdims=True)
    xn = (x * lax.rsqrt(jnp.maximum(ss, 1e-24))).astype(o_ref.dtype)
    o_ref[...] = xn
    ss_ref[...] = jnp.sum(xn.astype(jnp.float32) ** 2, axis=1, keepdims=True)


def _normalize_rows(x, block_rows, out_dtype):
    b, d = x.shape
    return pl.pallas_call(
        _normalize_kernel,
        out_shape=(jax.ShapeDtypeStruct((b, d), out_dtype),
                   jax.ShapeDtypeStruct((b, 1), jnp.float32)),
        grid=(b // block_rows,),
        in_specs=[pl.BlockSpec((block_rows, d), lambda i: (i, 0))],
        out_specs=(pl.BlockSpec((block_rows, d), lambda i: (i, 0)),
                   pl.BlockSpec((block_rows, 1), lambda i: (i, 0))),
        compiler_params=pltpu.CompilerParams(
            dimension_semantics=("parallel",)),
    )(x)


# ---------------------------------------------------------------------------
# Kernel 2: streaming (flash-style) reduction over the (B, B) similarity
# logits. grid = (query tiles ["parallel"], key tiles ["arbitrary"]).
# Per query-row tile it accumulates:
#   m = running max of (diag/pad)-excluded logits
#   l = running sum of exp(logits - m) over the excluded set
#   s = sum of logits over same-label columns (diagonal included; the wrapper
#       subtracts the exact self-logit once)
# ---------------------------------------------------------------------------
def _loss_kernel(q_ref, k_ref, labq_ref, labk_ref, m_ref, l_ref, s_ref,
                 *, inv_data_temp, b_valid, padded):
    qi = pl.program_id(0)
    ki = pl.program_id(1)
    tm = q_ref.shape[0]
    tk = k_ref.shape[0]

    @pl.when(ki == 0)
    def _():
        m_ref[...] = jnp.full_like(m_ref, _NEG_BIG)
        l_ref[...] = jnp.zeros_like(l_ref)
        s_ref[...] = jnp.zeros_like(s_ref)

    # (TM, TK) similarity tile: contraction over the feature dim on the MXU,
    # f32 accumulation regardless of operand dtype. No key transpose anywhere.
    logits = lax.dot_general(
        q_ref[...], k_ref[...],
        dimension_numbers=(((1,), (1,)), ((), ())),
        preferred_element_type=jnp.float32) * inv_data_temp

    # Global row/col ids for this tile (diag + padded-column exclusion).
    row_g = qi * tm + lax.broadcasted_iota(jnp.int32, (tm, tk), 0)
    col_g = ki * tk + lax.broadcasted_iota(jnp.int32, (tm, tk), 1)
    excl = row_g == col_g                       # self-similarity

    labk = labk_ref[pl.ds(ki, 1), :]            # (1, TK) slice of resident labels
    pos = labq_ref[...] == labk                 # (TM, TK) positive-pair mask

    if padded:
        invalid = col_g >= b_valid              # zero-padded key columns
        excl = jnp.logical_or(excl, invalid)
        pos = jnp.logical_and(pos, jnp.logical_not(invalid))

    # Online log-sum-exp over the key axis with the exclusions applied.
    masked = jnp.where(excl, _NEG_BIG, logits)
    m_old = m_ref[...]
    m_new = jnp.maximum(m_old, jnp.max(masked, axis=1, keepdims=True))
    e = jnp.exp(masked - m_new)
    l_ref[...] = (jnp.exp(m_old - m_new) * l_ref[...]
                  + jnp.sum(e, axis=1, keepdims=True))
    m_ref[...] = m_new

    # Positive-pair logit sum (single fused select, no mask materialization).
    s_ref[...] = s_ref[...] + jnp.sum(jnp.where(pos, logits, 0.0),
                                      axis=1, keepdims=True)


def contrastive_loss(features, labels=None, proxy=None,
                     data_temp=0.1, condition_temp=0.1,
                     block_q=None, block_k=None, compute_dtype=None):
    b, d = features.shape
    if labels is None:
        labels = jnp.arange(b, dtype=jnp.int32)       # mask == eye(B)
    labels = labels.reshape(-1).astype(jnp.int32)
    if labels.shape[0] != b:
        raise ValueError('Num of labels does not match num of features')

    # --- tiling: decoupled query/key tiles; batch padded to a tile multiple.
    if block_q is None or block_k is None:
        bp128 = _round_up(b, 128)
        default = 256 if (bp128 % 256 == 0 and bp128 >= 512) else 128
        block_q = block_q if block_q is not None else default
        block_k = block_k if block_k is not None else default
    bp = _round_up(b, max(block_q, block_k))
    if bp % block_q != 0 or bp % block_k != 0:
        raise ValueError('padded batch must be divisible by block_q and block_k')
    nq, nk = bp // block_q, bp // block_k
    padded = bp != b

    out_dtype = (jnp.dtype(compute_dtype) if compute_dtype is not None
                 else jnp.dtype(features.dtype))

    feats = features
    labs = labels
    if padded:
        feats = jnp.pad(feats, ((0, bp - b), (0, 0)))
        labs = jnp.pad(labs, (0, bp - b))

    # One normalize pass (Pallas) — emits MXU operands + exact row sum-sq.
    fn, ssn = _normalize_rows(feats, block_q, out_dtype)

    labs_col = labs.reshape(bp, 1)              # per-query-tile labels
    labs_key = labs.reshape(nk, block_k)        # resident key labels

    inv_dt = float(1.0 / data_temp)
    kernel = functools.partial(_loss_kernel, inv_data_temp=inv_dt,
                               b_valid=b, padded=padded)

    itemsize = out_dtype.itemsize
    cost = pl.CostEstimate(
        flops=2 * bp * bp * d,
        transcendentals=bp * bp,
        bytes_accessed=(nq + 1) * bp * d * itemsize + 8 * bp + 12 * bp)

    # Explicit VMEM budget (v7x only has 64 MiB physical — stay well under).
    vmem_need = (2 * (block_q + block_k) * d * itemsize
                 + 6 * block_q * block_k * 4 + (2 << 20))
    vmem_limit = int(min(max(vmem_need, 32 << 20), 48 << 20))

    m, l, s = pl.pallas_call(
        kernel,
        out_shape=(jax.ShapeDtypeStruct((bp, 1), jnp.float32),) * 3,
        grid_spec=pltpu.PrefetchScalarGridSpec(
            num_scalar_prefetch=0,
            grid=(nq, nk),
            in_specs=[
                pl.BlockSpec((block_q, d), lambda qi, ki: (qi, 0)),  # query rows
                pl.BlockSpec((block_k, d), lambda qi, ki: (ki, 0)),  # key rows
                pl.BlockSpec((block_q, 1), lambda qi, ki: (qi, 0)),  # query labels
                pl.BlockSpec((nk, block_k), lambda qi, ki: (0, 0)),  # key labels (resident)
            ],
            out_specs=(pl.BlockSpec((block_q, 1), lambda qi, ki: (qi, 0)),) * 3,
        ),
        compiler_params=pltpu.CompilerParams(
            dimension_semantics=("parallel", "arbitrary"),
            vmem_limit_bytes=vmem_limit),
        cost_estimate=cost,
    )(fn, fn, labs_col, labs_key)

    # --- tiny per-row finalize in XLA (msum, proxy column, combine, mean).
    m = m[:b, 0]
    l = l[:b, 0]
    s = s[:b, 0]
    # Subtract the exact self-similarity logit that `s` included.
    s = s - ssn[:b, 0] * inv_dt
    # Positives per row = (#same-label rows) - 1   (tiny (b,b) bool compare).
    msum = jnp.sum((labels[:, None] == labels[None, :]).astype(jnp.float32),
                   axis=1) - 1.0

    if proxy is not None:
        fq = fn[:b].astype(jnp.float32)
        pq = proxy.astype(jnp.float32)
        pq = pq * lax.rsqrt(jnp.maximum(
            jnp.sum(pq * pq, axis=1, keepdims=True), 1e-24))
        num = jnp.sum(fq * pq, axis=1)
        den = jnp.maximum(
            jnp.linalg.norm(fq, axis=1) * jnp.linalg.norm(pq, axis=1), 1e-8)
        d2c = num / den / condition_temp
        m2 = jnp.maximum(m, d2c)
        l = l * jnp.exp(m - m2) + jnp.exp(d2c - m2)
        m = m2
        s = s + d2c
        msum = msum + 1.0

    log_denom = m + jnp.log(l)
    mean_log_prob_pos = (s - msum * log_denom) / msum
    return -jnp.mean(mean_log_prob_pos)


# ---------------------------------------------------------------------------
# Pure-JAX reference mirroring the torch module (validation only).
# ---------------------------------------------------------------------------
def _reference_loss(features, labels=None, proxy=None,
                    data_temp=0.1, condition_temp=0.1):
    B = features.shape[0]
    if labels is None:
        mask = jnp.eye(B, dtype=jnp.float32)
    else:
        labels = labels.reshape(-1, 1)
        mask = (labels == labels.T).astype(jnp.float32)
    f = features / jnp.maximum(
        jnp.linalg.norm(features, axis=1, keepdims=True), 1e-12)
    logits = (f @ f.T) / data_temp
    logits_mask = jnp.ones((B, B), jnp.float32) - jnp.eye(B, dtype=jnp.float32)
    mask = mask * logits_mask
    if proxy is not None:
        p = proxy / jnp.maximum(
            jnp.linalg.norm(proxy, axis=1, keepdims=True), 1e-12)
        cos = jnp.sum(f * p, axis=1, keepdims=True) / jnp.maximum(
            jnp.linalg.norm(f, axis=1, keepdims=True)
            * jnp.linalg.norm(p, axis=1, keepdims=True), 1e-8)
        d2c = cos / condition_temp
        logits = jnp.concatenate([logits, d2c], axis=1)
        mask = jnp.concatenate([mask, jnp.ones_like(d2c)], axis=1)
        logits_mask = jnp.concatenate([logits_mask, jnp.ones_like(d2c)], axis=1)
    logits_max = jnp.max(logits, axis=1, keepdims=True)
    logits = logits - logits_max
    exp_logits = jnp.exp(logits) * logits_mask
    log_prob = logits - jnp.log(jnp.sum(exp_logits, axis=1, keepdims=True))
    mean_log_prob_pos = jnp.sum(mask * log_prob, axis=1) / jnp.sum(mask, axis=1)
    return -jnp.mean(mean_log_prob_pos)


if __name__ == "__main__":
    key = jax.random.PRNGKey(0)
    k1, k2, k3, k4, k5, k6 = jax.random.split(key, 6)

    # Case 1: tiny batch (padded to one 128-tile), labels + proxy, f32.
    B, D = 8, 32
    feats = jax.random.normal(k1, (B, D), dtype=jnp.float32)
    prox = jax.random.normal(k2, (B, D), dtype=jnp.float32)
    labs = jax.random.randint(k3, (B,), 0, 4, dtype=jnp.int32)
    out = jax.block_until_ready(contrastive_loss(feats, labels=labs, proxy=prox))
    ref = _reference_loss(feats, labels=labs, proxy=prox)
    assert jnp.allclose(out, ref, rtol=1e-3, atol=1e-3), (out, ref)

    # Case 2: multi-tile streaming path (2x2 grid of 128-tiles), labels, no proxy.
    B2, D2 = 256, 64
    feats2 = jax.random.normal(k4, (B2, D2), dtype=jnp.float32)
    labs2 = jnp.arange(B2, dtype=jnp.int32) % 8
    out2 = jax.block_until_ready(contrastive_loss(feats2, labels=labs2))
    ref2 = _reference_loss(feats2, labels=labs2)
    assert jnp.allclose(out2, ref2, rtol=1e-3, atol=1e-3), (out2, ref2)

    # Case 3: labels=None (mask == eye) with proxy.
    out3 = jax.block_until_ready(contrastive_loss(feats, proxy=prox))
    ref3 = _reference_loss(feats, proxy=prox)
    assert jnp.allclose(out3, ref3, rtol=1e-3, atol=1e-3), (out3, ref3)

    # Case 4: bf16 MXU operands (f32 accumulation) via compute_dtype.
    feats4 = jax.random.normal(k5, (B2, D2), dtype=jnp.float32)
    prox4 = jax.random.normal(k6, (B2, D2), dtype=jnp.float32)
    out4 = jax.block_until_ready(
        contrastive_loss(feats4, labels=labs2, proxy=prox4,
                         compute_dtype=jnp.bfloat16))
    ref4 = _reference_loss(feats4, labels=labs2, proxy=prox4)
    assert jnp.allclose(out4, ref4, rtol=1e-1, atol=1e-1), (out4, ref4)

    print("KERNEL_OK")
</pallas_src>

<mosaic_0001>
module attributes {stable_mosaic.version = 11 : i64} {
  func.func @_normalize_kernel(%arg0: i32, %arg1: memref<128x32xf32, #tpu.memory_space<vmem>>, %arg2: memref<128x32xf32, #tpu.memory_space<vmem>>, %arg3: memref<128x1xf32, #tpu.memory_space<vmem>>) attributes {dimension_semantics = [#tpu.dimension_semantics<parallel>], iteration_bounds = array<i64: 1>, scalar_prefetch = 0 : i64, scratch_operands = 0 : i64, tpu.core_type = #tpu.core_type<tc>, window_params = [{transform_indices = @transform_0, window_bounds = array<i64: 128, 32>}, {transform_indices = @transform_1, window_bounds = array<i64: 128, 32>}, {transform_indices = @transform_2, window_bounds = array<i64: 128, 1>}]} {
    %c0 = arith.constant 0 : index
    %c0_0 = arith.constant 0 : index
    %0 = vector.load %arg1[%c0, %c0_0] : memref<128x32xf32, #tpu.memory_space<vmem>>, vector<128x32xf32>
    %1 = arith.mulf %0, %0 : vector<128x32xf32>
    %cst = arith.constant dense<0.000000e+00> : vector<128xf32>
    %2 = vector.multi_reduction <add>, %1, %cst [1] : vector<128x32xf32> to vector<128xf32>
    %3 = vector.shape_cast %2 : vector<128xf32> to vector<128x1xf32>
    %cst_1 = arith.constant 1.000000e-24 : f32
    %4 = vector.broadcast %cst_1 : f32 to vector<128x1xf32>
    %5 = arith.maximumf %3, %4 : vector<128x1xf32>
    %6 = math.rsqrt %5 : vector<128x1xf32>
    %7 = vector.broadcast %6 : vector<128x1xf32> to vector<128x32xf32>
    %8 = arith.mulf %0, %7 : vector<128x32xf32>
    %c0_2 = arith.constant 0 : index
    %c0_3 = arith.constant 0 : index
    %9 = vector.load %arg2[%c0_2, %c0_3] : memref<128x32xf32, #tpu.memory_space<vmem>>, vector<128x32xf32>
    tpu.vector_store %arg2[%c0_2, %c0_3], %8 {strides = array<i32>} : memref<128x32xf32, #tpu.memory_space<vmem>>, vector<128x32xf32>,
    %10 = arith.mulf %8, %8 : vector<128x32xf32>
    %cst_4 = arith.constant dense<0.000000e+00> : vector<128xf32>
    %11 = vector.multi_reduction <add>, %10, %cst_4 [1] : vector<128x32xf32> to vector<128xf32>
    %12 = vector.shape_cast %11 : vector<128xf32> to vector<128x1xf32>
    %c0_5 = arith.constant 0 : index
    %c0_6 = arith.constant 0 : index
    %13 = vector.load %arg3[%c0_5, %c0_6] : memref<128x1xf32, #tpu.memory_space<vmem>>, vector<128x1xf32>
    tpu.vector_store %arg3[%c0_5, %c0_6], %12 {strides = array<i32>} : memref<128x1xf32, #tpu.memory_space<vmem>>, vector<128x1xf32>,
    return
  }
  func.func @transform_0(%arg0: i32) -> (i32, i32) {
    %c0_i32 = arith.constant 0 : i32
    %c0_i32_0 = arith.constant 0 : i32
    return %arg0, %c0_i32 : i32, i32
  }
  func.func @transform_1(%arg0: i32) -> (i32, i32) {
    %c0_i32 = arith.constant 0 : i32
    %c0_i32_0 = arith.constant 0 : i32
    return %arg0, %c0_i32 : i32, i32
  }
  func.func @transform_2(%arg0: i32) -> (i32, i32) {
    %c0_i32 = arith.constant 0 : i32
    %c0_i32_0 = arith.constant 0 : i32
    return %arg0, %c0_i32 : i32, i32
  }
}

</mosaic_0001>

<bundles_post_ra>
// kernel: tpu_custom_call.1
= control target key start
LH: loop header
LB: loop body
LE: loop exit
PB: predicated region body
PF: predicated region fallthrough
CT: control target
= control target key end

     0   :  { %vm42_vm0 = vcmask 261120   ;;  %vm219_vm1 = vcmask 7168   ;;  %s579_s0 = inlined_call_operand.vmem [shape: f32[128,32], index: 0, kind: input, shape index: {}]   ;;  %s580_s1 = inlined_call_operand.vmem [shape: f32[128,32], index: 1, kind: output, shape index: {0}]   ;;  %s581_s2 = inlined_call_operand.vmem [shape: f32[128,1], index: 2, kind: output, shape index: {1}]  }
   0x1   :  { %v294_v0 = vld [vmem:[%s579_s0] sm:$0xff]  ;;  %v299_v1 = vld [vmem:[%s579_s0 + $0x10] sm:$0xff]  ;;  %v304_v2 = vld [vmem:[%s579_s0 + $0x8] sm:$0xff] }
   0x2   :  { %v26_v3 = vmul.f32 %v294_v0, %v294_v0  ;;  %v28_v4 = vmul.f32 %v299_v1, %v299_v1  ;;  %v27_v5 = vmul.f32 %v304_v2, %v304_v2  ;;  %v315_v6 = vld [vmem:[%s579_s0 + $0x18] sm:$0xff]  ;;  %v322_v8 = vld [vmem:[%s579_s0 + $0x28] sm:$0xff]  ;;  %v327_v9 = vld [vmem:[%s579_s0 + $0x20] sm:$0xff] }
   0x3   :  { %v29_v7 = vmul.f32 %v315_v6, %v315_v6  ;;  %v31_v14 = vmul.f32 %v322_v8, %v322_v8  ;;  %v30_v15 = vmul.f32 %v327_v9, %v327_v9  ;;  %v340_v16 = vld [vmem:[%s579_s0 + $0x38] sm:$0xff]  ;;  %v345_v17 = vld [vmem:[%s579_s0 + $0x30] sm:$0xff]  ;;  %v356_v22 = vld [vmem:[%s579_s0 + $0x48] sm:$0xff] }
   0x4   :  { %v43_v10 = vsel %vm42_vm0, %v26_v3, 0.0  ;;  %v49_v11 = vsel %vm42_vm0, %v28_v4, 0.0  ;;  %v46_v12 = vsel %vm42_vm0, %v27_v5, 0.0  ;;  %v33_v20 = vmul.f32 %v340_v16, %v340_v16  ;;  %v361_v23 = vld [vmem:[%s579_s0 + $0x40] sm:$0xff]  ;;  %v372_v28 = vld [vmem:[%s579_s0 + $0x58] sm:$0xff]  ;;  %v377_v29 = vld [vmem:[%s579_s0 + $0x50] sm:$0xff] }
   0x5   :  { %44 = vadd.xlane.f32.xlu0 %v43_v10  ;;  %50 = vadd.xlane.f32.xlu1 %v49_v11  ;;  %v52_v13 = vsel %vm42_vm0, %v29_v7, 0.0  ;;  %v58_v18 = vsel %vm42_vm0, %v31_v14, 0.0  ;;  %v55_v19 = vsel %vm42_vm0, %v30_v15, 0.0  ;;  %v32_v21 = vmul.f32 %v345_v17, %v345_v17  ;;  %v388_v34 = vld [vmem:[%s579_s0 + $0x68] sm:$0xff]  ;;  %v393_v35 = vld [vmem:[%s579_s0 + $0x60] sm:$0xff]  ;;  %v404_v40 = vld [vmem:[%s579_s0 + $0x78] sm:$0xff] }
   0x6   :  { %v64_v24 = vsel %vm42_vm0, %v33_v20, 0.0  ;;  %v35_v26 = vmul.f32 %v356_v22, %v356_v22  ;;  %v34_v27 = vmul.f32 %v361_v23, %v361_v23  ;;  %v37_v32 = vmul.f32 %v372_v28, %v372_v28  ;;  %v409_v41 = vld [vmem:[%s579_s0 + $0x70] sm:$0xff] }
   0x7   :  { %v61_v25 = vsel %vm42_vm0, %v32_v21, 0.0  ;;  %v36_v33 = vmul.f32 %v377_v29, %v377_v29  ;;  %v39_v38 = vmul.f32 %v388_v34, %v388_v34  ;;  %v38_v39 = vmul.f32 %v393_v35, %v393_v35 }
   0x8   :  { %v70_v30 = vsel %vm42_vm0, %v35_v26, 0.0  ;;  %v67_v31 = vsel %vm42_vm0, %v34_v27, 0.0  ;;  %v76_v36 = vsel %vm42_vm0, %v37_v32, 0.0  ;;  %v41_v44 = vmul.f32 %v404_v40, %v404_v40 }
   0x9   :  { %47 = vadd.xlane.f32.xlu0 %v46_v12  ;;  %53 = vadd.xlane.f32.xlu1 %v52_v13  ;;  %v73_v37 = vsel %vm42_vm0, %v36_v33, 0.0  ;;  %v82_v42 = vsel %vm42_vm0, %v39_v38, 0.0  ;;  %v79_v43 = vsel %vm42_vm0, %v38_v39, 0.0  ;;  %v40_v45 = vmul.f32 %v409_v41, %v409_v41 }
   0xa   :  { %v88_v46 = vsel %vm42_vm0, %v41_v44, 0.0 }
   0xb   :  { %v85_v47 = vsel %vm42_vm0, %v40_v45, 0.0 }
   0xd   :  { %59 = vadd.xlane.f32.xlu1 %v58_v18  ;;  %56 = vadd.xlane.f32.xlu0 %v55_v19 }
  0x11   :  { %65 = vadd.xlane.f32.xlu1 %v64_v24  ;;  %62 = vadd.xlane.f32.xlu0 %v61_v25 }
  0x15   :  { %71 = vadd.xlane.f32.xlu1 %v70_v30  ;;  %68 = vadd.xlane.f32.xlu0 %v67_v31 }
  0x19   :  { %77 = vadd.xlane.f32.xlu1 %v76_v36  ;;  %74 = vadd.xlane.f32.xlu0 %v73_v37 }
  0x1d   :  { %83 = vadd.xlane.f32.xlu1 %v82_v42  ;;  %80 = vadd.xlane.f32.xlu0 %v79_v43 }
  0x21   :  { %89 = vadd.xlane.f32.xlu1 %v88_v46  ;;  %86 = vadd.xlane.f32.xlu0 %v85_v47 }
  0x92   :  { %v45_v48 = vpop.xlane.xlu0 %44  ;;  %v51_v49 = vpop.xlane.xlu1 %50 }
  0x93   :  { %v91_v50 = vmax.f32 %v45_v48, 1e-24  ;;  %v93_v51 = vmax.f32 %v51_v49, 1e-24 }
  0x95   :  { %244 = vrsqrt.f32 %v91_v50 }
  0x96   :  { %246 = vrsqrt.f32 %v93_v51  ;;  %v48_v52 = vpop.xlane.xlu0 %47  ;;  %v54_v53 = vpop.xlane.xlu1 %53 }
  0x97   :  { %v92_v54 = vmax.f32 %v48_v52, 1e-24  ;;  %v94_v55 = vmax.f32 %v54_v53, 1e-24 }
  0x99   :  { %248 = vrsqrt.f32 %v92_v54 }
  0x9a   :  { %250 = vrsqrt.f32 %v94_v55  ;;  %v60_v56 = vpop.xlane.xlu1 %59  ;;  %v57_v57 = vpop.xlane.xlu0 %56 }
  0x9b   :  { %v96_v58 = vmax.f32 %v60_v56, 1e-24  ;;  %v95_v59 = vmax.f32 %v57_v57, 1e-24 }
  0x9d   :  { %252 = vrsqrt.f32 %v96_v58 }
  0x9e   :  { %254 = vrsqrt.f32 %v95_v59  ;;  %v66_v60 = vpop.xlane.xlu1 %65  ;;  %v63_v61 = vpop.xlane.xlu0 %62 }
  0x9f   :  { %v245_v62 = vpop.eup %244  ;;  %v98_v63 = vmax.f32 %v66_v60, 1e-24  ;;  %v97_v3 = vmax.f32 %v63_v61, 1e-24 }
  0xa0   :  { %v247_v4 = vpop.eup %246  ;;  %v123_v5 = vmul.f32 %v245_v62, %v294_v0 }
  0xa1   :  { %256 = vrsqrt.f32 %v98_v63  ;;  %v125_v7 = vmul.f32 %v247_v4, %v299_v1 }
  0xa2   :  { %258 = vrsqrt.f32 %v97_v3  ;;  %v155_v10 = vmul.f32 %v123_v5, %v123_v5  ;;  %139 = vst.msk [vmem:[%s580_s1] sm:$0xff] %vm42_vm0, %v123_v5  ;;  %v72_v11 = vpop.xlane.xlu1 %71  ;;  %v69_v12 = vpop.xlane.xlu0 %68 }
  0xa3   :  { %v249_v13 = vpop.eup %248  ;;  %v100_v14 = vmax.f32 %v72_v11, 1e-24  ;;  %v99_v15 = vmax.f32 %v69_v12, 1e-24  ;;  %141 = vst.msk [vmem:[%s580_s1 + $0x10] sm:$0xff] %vm42_vm0, %v125_v7  ;;  %v157_v0 = vmul.f32 %v125_v7, %v125_v7 }
  0xa4   :  { %v251_v18 = vpop.eup %250  ;;  %v171_v1 = vsel %vm42_vm0, %v155_v10, 0.0  ;;  %v124_v19 = vmul.f32 %v249_v13, %v304_v2 }
  0xa5   :  { %172 = vadd.xlane.f32.xlu0 %v171_v1  ;;  %260 = vrsqrt.f32 %v100_v14  ;;  %v126_v20 = vmul.f32 %v251_v18, %v315_v6  ;;  %v177_v21 = vsel %vm42_vm0, %v157_v0, 0.0 }
  0xa6   :  { %262 = vrsqrt.f32 %v99_v15  ;;  %v156_v24 = vmul.f32 %v124_v19, %v124_v19  ;;  %140 = vst.msk [vmem:[%s580_s1 + $0x8] sm:$0xff] %vm42_vm0, %v124_v19  ;;  %v78_v25 = vpop.xlane.xlu1 %77  ;;  %v75_v26 = vpop.xlane.xlu0 %74 }
  0xa7   :  { %v253_v27 = vpop.eup %252  ;;  %v102_v30 = vmax.f32 %v78_v25, 1e-24  ;;  %v101_v31 = vmax.f32 %v75_v26, 1e-24  ;;  %142 = vst.msk [vmem:[%s580_s1 + $0x18] sm:$0xff] %vm42_vm0, %v126_v20  ;;  %v158_v2 = vmul.f32 %v126_v20, %v126_v20 }
  0xa8   :  { %v255_v6 = vpop.eup %254  ;;  %v174_v32 = vsel %vm42_vm0, %v156_v24, 0.0  ;;  %v128_v33 = vmul.f32 %v253_v27, %v322_v8 }
  0xa9   :  { %178 = vadd.xlane.f32.xlu0 %v177_v21  ;;  %175 = vadd.xlane.f32.xlu1 %v174_v32  ;;  %264 = vrsqrt.f32 %v102_v30  ;;  %v127_v36 = vmul.f32 %v255_v6, %v327_v9  ;;  %v180_v37 = vsel %vm42_vm0, %v158_v2, 0.0 }
  0xaa   :  { %266 = vrsqrt.f32 %v101_v31  ;;  %v84_v38 = vpop.xlane.xlu1 %83  ;;  %v81_v39 = vpop.xlane.xlu0 %80  ;;  %144 = vst.msk [vmem:[%s580_s1 + $0x28] sm:$0xff] %vm42_vm0, %v128_v33  ;;  %v160_v42 = vmul.f32 %v128_v33, %v128_v33 }
  0xab   :  { %v257_v43 = vpop.eup %256  ;;  %v104_v44 = vmax.f32 %v84_v38, 1e-24  ;;  %v103_v45 = vmax.f32 %v81_v39, 1e-24  ;;  %v159_v8 = vmul.f32 %v127_v36, %v127_v36  ;;  %143 = vst.msk [vmem:[%s580_s1 + $0x20] sm:$0xff] %vm42_vm0, %v127_v36 }
  0xac   :  { %v259_v9 = vpop.eup %258  ;;  %v130_v46 = vmul.f32 %v257_v43, %v340_v16  ;;  %v186_v49 = vsel %vm42_vm0, %v160_v42, 0.0 }
  0xad   :  { %181 = vadd.xlane.f32.xlu1 %v180_v37  ;;  %268 = vrsqrt.f32 %v104_v44  ;;  %v183_v47 = vsel %vm42_vm0, %v159_v8, 0.0  ;;  %v129_v48 = vmul.f32 %v259_v9, %v345_v17 }
  0xae   :  { %270 = vrsqrt.f32 %v103_v45  ;;  %184 = vadd.xlane.f32.xlu0 %v183_v47  ;;  %v90_v50 = vpop.xlane.xlu1 %89  ;;  %v87_v51 = vpop.xlane.xlu0 %86  ;;  %146 = vst.msk [vmem:[%s580_s1 + $0x38] sm:$0xff] %vm42_vm0, %v130_v46  ;;  %v162_v52 = vmul.f32 %v130_v46, %v130_v46 }
  0xaf   :  { %v261_v53 = vpop.eup %260  ;;  %v106_v16 = vmax.f32 %v90_v50, 1e-24  ;;  %v105_v54 = vmax.f32 %v87_v51, 1e-24  ;;  %v161_v55 = vmul.f32 %v129_v48, %v129_v48  ;;  %145 = vst.msk [vmem:[%s580_s1 + $0x30] sm:$0xff] %vm42_vm0, %v129_v48 }
  0xb0   :  { %v263_v17 = vpop.eup %262  ;;  %v132_v56 = vmul.f32 %v261_v53, %v356_v22  ;;  %v192_v59 = vsel %vm42_vm0, %v162_v52, 0.0 }
  0xb1   :  { %187 = vadd.xlane.f32.xlu1 %v186_v49  ;;  %272 = vrsqrt.f32 %v106_v16  ;;  %v189_v57 = vsel %vm42_vm0, %v161_v55, 0.0  ;;  %v131_v58 = vmul.f32 %v263_v17, %v361_v23 }
  0xb2   :  { %274 = vrsqrt.f32 %v105_v54  ;;  %190 = vadd.xlane.f32.xlu0 %v189_v57  ;;  %148 = vst.msk [vmem:[%s580_s1 + $0x48] sm:$0xff] %vm42_vm0, %v132_v56  ;;  %v164_v60 = vmul.f32 %v132_v56, %v132_v56 }
  0xb3   :  { %v265_v61 = vpop.eup %264  ;;  %v163_v62 = vmul.f32 %v131_v58, %v131_v58  ;;  %147 = vst.msk [vmem:[%s580_s1 + $0x40] sm:$0xff] %vm42_vm0, %v131_v58 }
  0xb4   :  { %v267_v22 = vpop.eup %266  ;;  %v134_v23 = vmul.f32 %v265_v61, %v372_v28  ;;  %v198_v4 = vsel %vm42_vm0, %v164_v60, 0.0 }
  0xb5   :  { %193 = vadd.xlane.f32.xlu1 %v192_v59  ;;  %v195_v63 = vsel %vm42_vm0, %v163_v62, 0.0  ;;  %v133_v3 = vmul.f32 %v267_v22, %v377_v29 }
  0xb6   :  { %196 = vadd.xlane.f32.xlu0 %v195_v63  ;;  %150 = vst.msk [vmem:[%s580_s1 + $0x58] sm:$0xff] %vm42_vm0, %v134_v23  ;;  %v166_v5 = vmul.f32 %v134_v23, %v134_v23 }
  0xb7   :  { %v269_v7 = vpop.eup %268  ;;  %v165_v10 = vmul.f32 %v133_v3, %v133_v3  ;;  %149 = vst.msk [vmem:[%s580_s1 + $0x50] sm:$0xff] %vm42_vm0, %v133_v3 }
  0xb8   :  { %v271_v28 = vpop.eup %270  ;;  %v136_v11 = vmul.f32 %v269_v7, %v388_v34  ;;  %v204_v13 = vsel %vm42_vm0, %v166_v5, 0.0 }
  0xb9   :  { %199 = vadd.xlane.f32.xlu1 %v198_v4  ;;  %v201_v29 = vsel %vm42_vm0, %v165_v10, 0.0  ;;  %v135_v12 = vmul.f32 %v271_v28, %v393_v35 }
  0xba   :  { %202 = vadd.xlane.f32.xlu0 %v201_v29  ;;  %152 = vst.msk [vmem:[%s580_s1 + $0x68] sm:$0xff] %vm42_vm0, %v136_v11  ;;  %v168_v14 = vmul.f32 %v136_v11, %v136_v11 }
  0xbb   :  { %v273_v15 = vpop.eup %272  ;;  %v167_v0 = vmul.f32 %v135_v12, %v135_v12  ;;  %151 = vst.msk [vmem:[%s580_s1 + $0x60] sm:$0xff] %vm42_vm0, %v135_v12 }
  0xbc   :  { %v275_v34 = vpop.eup %274  ;;  %v138_v18 = vmul.f32 %v273_v15, %v404_v40  ;;  %v210_v19 = vsel %vm42_vm0, %v168_v14, 0.0 }
  0xbd   :  { %205 = vadd.xlane.f32.xlu1 %v204_v13  ;;  %v207_v35 = vsel %vm42_vm0, %v167_v0, 0.0  ;;  %v137_v1 = vmul.f32 %v275_v34, %v409_v41 }
  0xbe   :  { %208 = vadd.xlane.f32.xlu0 %v207_v35  ;;  %154 = vst.msk [vmem:[%s580_s1 + $0x78] sm:$0xff] %vm42_vm0, %v138_v18  ;;  %v170_v20 = vmul.f32 %v138_v18, %v138_v18 }
  0xbf   :  { %v169_v21 = vmul.f32 %v137_v1, %v137_v1  ;;  %153 = vst.msk [vmem:[%s580_s1 + $0x70] sm:$0xff] %vm42_vm0, %v137_v1 }
  0xc0   :  { %v216_v41 = vsel %vm42_vm0, %v170_v20, 0.0 }
  0xc1   :  { %211 = vadd.xlane.f32.xlu1 %v210_v19  ;;  %v213_v40 = vsel %vm42_vm0, %v169_v21, 0.0 }
  0xc2   :  { %214 = vadd.xlane.f32.xlu0 %v213_v40 }
  0xc5   :  { %217 = vadd.xlane.f32.xlu1 %v216_v41 }
 0x132   :  { %v173_v24 = vpop.xlane.xlu0 %172 }
 0x133   :  { %220 = vst.msk [vmem:[%s581_s2] sm:$0xff] %vm219_vm1, %v173_v24 }
 0x136   :  { %v176_v25 = vpop.xlane.xlu1 %175  ;;  %v179_v26 = vpop.xlane.xlu0 %178 }
 0x137   :  { %221 = vst.msk [vmem:[%s581_s2 + $0x8] sm:$0xff] %vm219_vm1, %v176_v25  ;;  %222 = vst.msk [vmem:[%s581_s2 + $0x10] sm:$0xff] %vm219_vm1, %v179_v26 }
 0x13a   :  { %v182_v27 = vpop.xlane.xlu1 %181 }
 0x13b   :  { %223 = vst.msk [vmem:[%s581_s2 + $0x18] sm:$0xff] %vm219_vm1, %v182_v27  ;;  %v185_v30 = vpop.xlane.xlu0 %184 }
 0x13c   :  { %224 = vst.msk [vmem:[%s581_s2 + $0x20] sm:$0xff] %vm219_vm1, %v185_v30 }
 0x13e   :  { %v188_v31 = vpop.xlane.xlu1 %187 }
 0x13f   :  { %225 = vst.msk [vmem:[%s581_s2 + $0x28] sm:$0xff] %vm219_vm1, %v188_v31  ;;  %v191_v2 = vpop.xlane.xlu0 %190 }
 0x140   :  { %226 = vst.msk [vmem:[%s581_s2 + $0x30] sm:$0xff] %vm219_vm1, %v191_v2 }
 0x142   :  { %v194_v6 = vpop.xlane.xlu1 %193 }
 0x143   :  { %227 = vst.msk [vmem:[%s581_s2 + $0x38] sm:$0xff] %vm219_vm1, %v194_v6  ;;  %v197_v32 = vpop.xlane.xlu0 %196 }
 0x144   :  { %228 = vst.msk [vmem:[%s581_s2 + $0x40] sm:$0xff] %vm219_vm1, %v197_v32 }
 0x146   :  { %v200_v33 = vpop.xlane.xlu1 %199 }
 0x147   :  { %229 = vst.msk [vmem:[%s581_s2 + $0x48] sm:$0xff] %vm219_vm1, %v200_v33  ;;  %v203_v36 = vpop.xlane.xlu0 %202 }
 0x148   :  { %230 = vst.msk [vmem:[%s581_s2 + $0x50] sm:$0xff] %vm219_vm1, %v203_v36 }
 0x14a   :  { %v206_v37 = vpop.xlane.xlu1 %205 }
 0x14b   :  { %231 = vst.msk [vmem:[%s581_s2 + $0x58] sm:$0xff] %vm219_vm1, %v206_v37  ;;  %v209_v38 = vpop.xlane.xlu0 %208 }
 0x14c   :  { %232 = vst.msk [vmem:[%s581_s2 + $0x60] sm:$0xff] %vm219_vm1, %v209_v38 }
 0x14e   :  { %v212_v39 = vpop.xlane.xlu1 %211 }
 0x14f   :  { %233 = vst.msk [vmem:[%s581_s2 + $0x68] sm:$0xff] %vm219_vm1, %v212_v39  ;;  %v215_v42 = vpop.xlane.xlu0 %214 }
 0x150   :  { %234 = vst.msk [vmem:[%s581_s2 + $0x70] sm:$0xff] %vm219_vm1, %v215_v42 }
 0x152   :  { %v218_v43 = vpop.xlane.xlu1 %217 }
 0x153   :  { %235 = vst.msk [vmem:[%s581_s2 + $0x78] sm:$0xff] %vm219_vm1, %v218_v43 }

</bundles_post_ra>
